<compile_context>
chip_gen: v7x
topology: tpu7x:2x2x1
jax: 0.10.0
libtpu: 0.0.40
codegen_flags: <defaults>
</compile_context>

<pallas_src>
import functools

import numpy as np
import jax
import jax.numpy as jnp
from jax.experimental import pallas as pl
from jax.experimental.pallas import tpu as pltpu

Block_dimension = 256


# ---------------------------------------------------------------------------
# Kernel: O[M, N] = X[M, K] @ W_T[K, N], with per-(k, n-sub-block) substitution
# of trainable 256x256 blocks selected through the SMEM sel_id table.
# ---------------------------------------------------------------------------
def _make_smt_kernel(bn):
    """Build the kernel for tn = bn * 256 output columns per tile."""

    def kernel(sel_ref, x_ref, wt_ref, *rest):
        # sel_ref   : SMEM int32 [K/256, N/256]          (scalar prefetch)
        # x_ref     : VMEM bf16  (tm, 256)
        # wt_ref    : VMEM bf16  (256, bn*256)            frozen W.T tile
        # rest[:bn] : VMEM bf16  (1, 256, 256) each       trainable block feeds
        # rest[bn]  : VMEM       (tm, bn*256)  out        written on last k only
        # rest[bn+1]: VMEM f32   (tm, bn*256)  accumulator scratch
        selw_refs = rest[:bn]
        o_ref = rest[bn]
        acc_ref = rest[bn + 1]

        j = pl.program_id(1)
        k = pl.program_id(2)

        @pl.when(k == 0)
        def _init():
            acc_ref[...] = jnp.zeros_like(acc_ref)

        x = x_ref[...]
        for h in range(bn):                    # static unroll over sub-tiles
            lo = h * Block_dimension
            hi = lo + Block_dimension
            sel = sel_ref[k, bn * j + h]

            @pl.when(sel == 0)
            def _frozen_tile(lo=lo, hi=hi):
                acc_ref[:, lo:hi] += jnp.dot(
                    x, wt_ref[:, lo:hi], preferred_element_type=jnp.float32)

            @pl.when(sel > 0)
            def _trainable_tile(lo=lo, hi=hi, h=h):
                acc_ref[:, lo:hi] += jnp.dot(
                    x, selw_refs[h][0], preferred_element_type=jnp.float32)

        @pl.when(k == pl.num_programs(2) - 1)
        def _store():
            o_ref[...] = acc_ref[...].astype(o_ref.dtype)

    return kernel


def _smt_matmul(sel_id, x2d, w_t, sel_blocks, *, tm, bn, out_dtype):
    """x2d: (M, K) bf16, w_t: (K, N) bf16, sel_blocks: (num, 256, 256) bf16."""
    M, K = x2d.shape
    Kw, N = w_t.shape
    assert K == Kw
    tn = bn * Block_dimension
    grid = (M // tm, N // tn, K // Block_dimension)

    # One trainable-block feed per 256-column sub-tile; block index is
    # data-dependent via the SMEM table.  Non-selected positions re-request
    # block 0, whose DMA is elided when the block index does not change.
    selw_specs = [
        pl.BlockSpec(
            (1, Block_dimension, Block_dimension),
            lambda i, j, k, sel, h=h:
                (jnp.maximum(sel[k, bn * j + h] - 1, 0), 0, 0))
        for h in range(bn)
    ]

    return pl.pallas_call(
        _make_smt_kernel(bn),
        out_shape=jax.ShapeDtypeStruct((M, N), out_dtype),
        grid_spec=pltpu.PrefetchScalarGridSpec(
            num_scalar_prefetch=1,
            grid=grid,
            in_specs=[
                pl.BlockSpec((tm, Block_dimension),
                             lambda i, j, k, sel: (i, k)),
                pl.BlockSpec((Block_dimension, tn),
                             lambda i, j, k, sel: (k, j)),
                *selw_specs,
            ],
            out_specs=pl.BlockSpec((tm, tn), lambda i, j, k, sel: (i, j)),
            scratch_shapes=[pltpu.VMEM((tm, tn), jnp.float32)],
        ),
        compiler_params=pltpu.CompilerParams(
            dimension_semantics=("parallel", "parallel", "arbitrary"),
            vmem_limit_bytes=32 * 1024 * 1024,
        ),
    )(sel_id, x2d, w_t, *([sel_blocks] * bn))


# ---------------------------------------------------------------------------
# Module-equivalent wrappers
# ---------------------------------------------------------------------------
def prepare_frozen_weight(weight):
    """One-time prep of the frozen base weight: transpose to
    [in_features, out_features] and cast to bf16 so the kernel streams a
    canonical MXU RHS at half the HBM traffic.  Paid once, not per forward."""
    return jnp.asarray(weight).T.astype(jnp.bfloat16)


def _sel_id_table(index_list, nb_k, nb_n):
    tbl = np.zeros((nb_k, nb_n), dtype=np.int32)
    for i, (r, c) in enumerate(index_list):
        # Block (r, c) of weight[N, K] lives at block (c, r) of W_T[K, N].
        # Later entries overwrite earlier ones (matches torch in-place order).
        tbl[c, r] = i + 1
    return tbl


def _choose_tm_and_padded_m(m):
    """Pick the largest tm in {1024, 512, 256} whose padding waste stays below
    ~1/8 of the padded extent, and pad M up to a multiple of that tm (never a
    bare multiple of 8, so the tile can't collapse to 8/16/32 rows).  Tiny
    M (< 256) gets a single tile rounded to bf16 (16, 128) packing."""
    if m < Block_dimension:
        mp = max(16, ((m + 15) // 16) * 16)
        return mp, mp
    tm, mp = 256, ((m + 255) // 256) * 256
    for cand in (512, 1024):
        cand_mp = ((m + cand - 1) // cand) * cand
        if cand_mp - m <= cand_mp // 8:
            tm, mp = cand, cand_mp
    return tm, mp


def linear_matrix_sparsity_forward(x, weight_t, selected_weight, index_list):
    """Forward pass of LinearLayer_MatrixSparsity.

    x:               [batch, seq, in_features]
    weight_t:        [in_features, out_features]  (pre-transposed frozen W, bf16)
    selected_weight: [len(index_list)*256, 256]   trainable blocks, original
                     [out, in] orientation (same as the PyTorch module)
    index_list:      static list of (row, col) block indices into the original
                     [out_features, in_features] weight
    returns:         [batch, seq, out_features]  (same dtype as x)
    """
    B, S, K = x.shape
    Kw, N = weight_t.shape
    assert K == Kw, (K, Kw)
    assert K % Block_dimension == 0 and N % Block_dimension == 0

    num = len(index_list)
    if num == 0:
        sel_blocks = jnp.zeros((1, Block_dimension, Block_dimension),
                               jnp.bfloat16)
    else:
        sel_blocks = (selected_weight
                      .reshape(num, Block_dimension, Block_dimension)
                      .transpose(0, 2, 1)            # -> W.T orientation
                      .astype(jnp.bfloat16))

    sel_id = jnp.asarray(_sel_id_table(index_list,
                                       K // Block_dimension,
                                       N // Block_dimension))

    # Two sparsity blocks per output tile when the shape allows it: halves the
    # X re-stream (X is re-DMA'd once per N tile).
    bn = 2 if N % (2 * Block_dimension) == 0 else 1

    M = B * S
    tm, Mp = _choose_tm_and_padded_m(M)
    x2d = x.reshape(M, K).astype(jnp.bfloat16)
    if Mp != M:
        x2d = jnp.pad(x2d, ((0, Mp - M), (0, 0)))

    out2d = _smt_matmul(sel_id, x2d, weight_t, sel_blocks,
                        tm=tm, bn=bn, out_dtype=x.dtype)
    return out2d[:M].reshape(B, S, N)


# ---------------------------------------------------------------------------
# Demo / self-test
# ---------------------------------------------------------------------------
if __name__ == "__main__":
    key = jax.random.PRNGKey(0)
    k_w, k_sw, k_x = jax.random.split(key, 3)

    # Block_dimension-consistent small sizes: hidden = 2 blocks * 256 = 512.
    batch, seq, hidden = 2, 8, 2 * Block_dimension
    index_list = [(0, 1), (1, 0)]   # two selected 256x256 blocks

    weight = jax.random.normal(k_w, (hidden, hidden), dtype=jnp.float32) * 0.02
    selected_weight = jax.random.normal(
        k_sw, (len(index_list) * Block_dimension, Block_dimension),
        dtype=jnp.float32) * 0.02
    x = jax.random.normal(k_x, (batch, seq, hidden), dtype=jnp.float32)

    # One-time frozen-weight prep (transpose + bf16 cast) — not per call.
    weight_t = prepare_frozen_weight(weight)

    fwd = jax.jit(functools.partial(linear_matrix_sparsity_forward,
                                    index_list=index_list))
    out = jax.block_until_ready(fwd(x, weight_t, selected_weight))

    # Pure-JAX reference with the same bf16 operands / f32 accumulation.
    w_full = weight
    for i, (r, c) in enumerate(index_list):
        w_full = w_full.at[r * Block_dimension:(r + 1) * Block_dimension,
                           c * Block_dimension:(c + 1) * Block_dimension].set(
            selected_weight[i * Block_dimension:(i + 1) * Block_dimension, :])
    ref = jnp.einsum(
        "bsk,nk->bsn",
        x.astype(jnp.bfloat16).astype(jnp.float32),
        w_full.astype(jnp.bfloat16).astype(jnp.float32))

    assert out.shape == (batch, seq, hidden), out.shape
    assert out.dtype == x.dtype, out.dtype
    assert jnp.allclose(out, ref, atol=1e-2, rtol=1e-2), "mismatch vs reference"
    print("KERNEL_OK")
</pallas_src>

<mosaic_0001>
module attributes {stable_mosaic.version = 11 : i64} {
  func.func @kernel(%arg0: i32, %arg1: i32, %arg2: i32, %arg3: memref<2x2xi32, #tpu.memory_space<smem>>, %arg4: memref<16x256xbf16, #tpu.memory_space<vmem>>, %arg5: memref<256x512xbf16, #tpu.memory_space<vmem>>, %arg6: memref<1x256x256xbf16, #tpu.memory_space<vmem>>, %arg7: memref<1x256x256xbf16, #tpu.memory_space<vmem>>, %arg8: memref<16x512xf32, #tpu.memory_space<vmem>>, %arg9: memref<16x512xf32, #tpu.memory_space<vmem>>) attributes {dimension_semantics = [#tpu.dimension_semantics<parallel>, #tpu.dimension_semantics<parallel>, #tpu.dimension_semantics<arbitrary>], iteration_bounds = array<i64: 1, 1, 2>, scalar_prefetch = 1 : i64, scratch_operands = 1 : i64, tpu.core_type = #tpu.core_type<tc>, window_params = [{transform_indices = @transform_0, window_bounds = array<i64: 16, 256>}, {transform_indices = @transform_1, window_bounds = array<i64: 256, 512>}, {transform_indices = @transform_2, window_bounds = array<i64: 1, 256, 256>}, {transform_indices = @transform_3, window_bounds = array<i64: 1, 256, 256>}, {transform_indices = @transform_4, window_bounds = array<i64: 16, 512>}]} {
    %c0_i32 = arith.constant 0 : i32
    %0 = arith.cmpi eq, %arg2, %c0_i32 : i32
    %1 = arith.extui %0 : i1 to i32
    %c0_i32_0 = arith.constant 0 : i32
    %2 = arith.cmpi ne, %1, %c0_i32_0 : i32
    scf.if %2 {
      %cst = arith.constant 0.000000e+00 : f32
      %29 = vector.broadcast %cst : f32 to vector<16x512xf32>
      %c0_14 = arith.constant 0 : index
      %c0_15 = arith.constant 0 : index
      %30 = vector.load %arg9[%c0_14, %c0_15] : memref<16x512xf32, #tpu.memory_space<vmem>>, vector<16x512xf32>
      tpu.vector_store %arg9[%c0_14, %c0_15], %29 {strides = array<i32>} : memref<16x512xf32, #tpu.memory_space<vmem>>, vector<16x512xf32>,
    } else {
    }
    %c0 = arith.constant 0 : index
    %c0_1 = arith.constant 0 : index
    %3 = vector.load %arg4[%c0, %c0_1] : memref<16x256xbf16, #tpu.memory_space<vmem>>, vector<16x256xbf16>
    %c2_i32 = arith.constant 2 : i32
    %4 = arith.muli %c2_i32, %arg1 : i32
    %c0_i32_2 = arith.constant 0 : i32
    %5 = arith.addi %4, %c0_i32_2 : i32
    %6 = arith.index_cast %arg2 : i32 to index
    %7 = arith.index_cast %5 : i32 to index
    %8 = memref.load %arg3[%6, %7] : memref<2x2xi32, #tpu.memory_space<smem>>
    %c0_i32_3 = arith.constant 0 : i32
    %9 = arith.cmpi eq, %8, %c0_i32_3 : i32
    %10 = arith.extui %9 : i1 to i32
    %c0_i32_4 = arith.constant 0 : i32
    %11 = arith.cmpi ne, %10, %c0_i32_4 : i32
    scf.if %11 {
      %c0_14 = arith.constant 0 : index
      %c0_15 = arith.constant 0 : index
      %29 = vector.load %arg9[%c0_14, %c0_15] : memref<16x512xf32, #tpu.memory_space<vmem>>, vector<16x256xf32>
      %c0_16 = arith.constant 0 : index
      %c0_17 = arith.constant 0 : index
      %30 = vector.load %arg5[%c0_16, %c0_17] : memref<256x512xbf16, #tpu.memory_space<vmem>>, vector<256x256xbf16>
      %cst = arith.constant dense<0.000000e+00> : vector<16x256xf32>
      %31 = tpu.matmul %3, %30, %cst {dimension_numbers = #tpu.dot_dimension_numbers<[1], [0], [0], [1], [0, 0, 1, 1], [], []>} : vector<16x256xbf16>, vector<256x256xbf16>, vector<16x256xf32> -> vector<16x256xf32>
      %32 = arith.addf %29, %31 : vector<16x256xf32>
      %c0_18 = arith.constant 0 : index
      %c0_19 = arith.constant 0 : index
      %33 = vector.load %arg9[%c0_18, %c0_19] : memref<16x512xf32, #tpu.memory_space<vmem>>, vector<16x256xf32>
      tpu.vector_store %arg9[%c0_18, %c0_19], %32 {strides = array<i32>} : memref<16x512xf32, #tpu.memory_space<vmem>>, vector<16x256xf32>,
    } else {
    }
    %c0_i32_5 = arith.constant 0 : i32
    %12 = arith.cmpi sgt, %8, %c0_i32_5 : i32
    %13 = arith.extui %12 : i1 to i32
    %c0_i32_6 = arith.constant 0 : i32
    %14 = arith.cmpi ne, %13, %c0_i32_6 : i32
    scf.if %14 {
      %c0_14 = arith.constant 0 : index
      %c0_15 = arith.constant 0 : index
      %29 = vector.load %arg9[%c0_14, %c0_15] : memref<16x512xf32, #tpu.memory_space<vmem>>, vector<16x256xf32>
      %c0_16 = arith.constant 0 : index
      %c0_17 = arith.constant 0 : index
      %c0_18 = arith.constant 0 : index
      %30 = vector.load %arg6[%c0_16, %c0_17, %c0_18] : memref<1x256x256xbf16, #tpu.memory_space<vmem>>, vector<1x256x256xbf16>
      %31 = vector.shape_cast %30 : vector<1x256x256xbf16> to vector<256x256xbf16>
      %cst = arith.constant dense<0.000000e+00> : vector<16x256xf32>
      %32 = tpu.matmul %3, %31, %cst {dimension_numbers = #tpu.dot_dimension_numbers<[1], [0], [0], [1], [0, 0, 1, 1], [], []>} : vector<16x256xbf16>, vector<256x256xbf16>, vector<16x256xf32> -> vector<16x256xf32>
      %33 = arith.addf %29, %32 : vector<16x256xf32>
      %c0_19 = arith.constant 0 : index
      %c0_20 = arith.constant 0 : index
      %34 = vector.load %arg9[%c0_19, %c0_20] : memref<16x512xf32, #tpu.memory_space<vmem>>, vector<16x256xf32>
      tpu.vector_store %arg9[%c0_19, %c0_20], %33 {strides = array<i32>} : memref<16x512xf32, #tpu.memory_space<vmem>>, vector<16x256xf32>,
    } else {
    }
    %c2_i32_7 = arith.constant 2 : i32
    %15 = arith.muli %c2_i32_7, %arg1 : i32
    %c1_i32 = arith.constant 1 : i32
    %16 = arith.addi %15, %c1_i32 : i32
    %17 = arith.index_cast %arg2 : i32 to index
    %18 = arith.index_cast %16 : i32 to index
    %19 = memref.load %arg3[%17, %18] : memref<2x2xi32, #tpu.memory_space<smem>>
    %c0_i32_8 = arith.constant 0 : i32
    %20 = arith.cmpi eq, %19, %c0_i32_8 : i32
    %21 = arith.extui %20 : i1 to i32
    %c0_i32_9 = arith.constant 0 : i32
    %22 = arith.cmpi ne, %21, %c0_i32_9 : i32
    scf.if %22 {
      %c0_14 = arith.constant 0 : index
      %c256 = arith.constant 256 : index
      %29 = vector.load %arg9[%c0_14, %c256] : memref<16x512xf32, #tpu.memory_space<vmem>>, vector<16x256xf32>
      %c0_15 = arith.constant 0 : index
      %c256_16 = arith.constant 256 : index
      %30 = vector.load %arg5[%c0_15, %c256_16] : memref<256x512xbf16, #tpu.memory_space<vmem>>, vector<256x256xbf16>
      %cst = arith.constant dense<0.000000e+00> : vector<16x256xf32>
      %31 = tpu.matmul %3, %30, %cst {dimension_numbers = #tpu.dot_dimension_numbers<[1], [0], [0], [1], [0, 0, 1, 1], [], []>} : vector<16x256xbf16>, vector<256x256xbf16>, vector<16x256xf32> -> vector<16x256xf32>
      %32 = arith.addf %29, %31 : vector<16x256xf32>
      %c0_17 = arith.constant 0 : index
      %c256_18 = arith.constant 256 : index
      %33 = vector.load %arg9[%c0_17, %c256_18] : memref<16x512xf32, #tpu.memory_space<vmem>>, vector<16x256xf32>
      tpu.vector_store %arg9[%c0_17, %c256_18], %32 {strides = array<i32>} : memref<16x512xf32, #tpu.memory_space<vmem>>, vector<16x256xf32>,
    } else {
    }
    %c0_i32_10 = arith.constant 0 : i32
    %23 = arith.cmpi sgt, %19, %c0_i32_10 : i32
    %24 = arith.extui %23 : i1 to i32
    %c0_i32_11 = arith.constant 0 : i32
    %25 = arith.cmpi ne, %24, %c0_i32_11 : i32
    scf.if %25 {
      %c0_14 = arith.constant 0 : index
      %c256 = arith.constant 256 : index
      %29 = vector.load %arg9[%c0_14, %c256] : memref<16x512xf32, #tpu.memory_space<vmem>>, vector<16x256xf32>
      %c0_15 = arith.constant 0 : index
      %c0_16 = arith.constant 0 : index
      %c0_17 = arith.constant 0 : index
      %30 = vector.load %arg7[%c0_15, %c0_16, %c0_17] : memref<1x256x256xbf16, #tpu.memory_space<vmem>>, vector<1x256x256xbf16>
      %31 = vector.shape_cast %30 : vector<1x256x256xbf16> to vector<256x256xbf16>
      %cst = arith.constant dense<0.000000e+00> : vector<16x256xf32>
      %32 = tpu.matmul %3, %31, %cst {dimension_numbers = #tpu.dot_dimension_numbers<[1], [0], [0], [1], [0, 0, 1, 1], [], []>} : vector<16x256xbf16>, vector<256x256xbf16>, vector<16x256xf32> -> vector<16x256xf32>
      %33 = arith.addf %29, %32 : vector<16x256xf32>
      %c0_18 = arith.constant 0 : index
      %c256_19 = arith.constant 256 : index
      %34 = vector.load %arg9[%c0_18, %c256_19] : memref<16x512xf32, #tpu.memory_space<vmem>>, vector<16x256xf32>
      tpu.vector_store %arg9[%c0_18, %c256_19], %33 {strides = array<i32>} : memref<16x512xf32, #tpu.memory_space<vmem>>, vector<16x256xf32>,
    } else {
    }
    %c1_i32_12 = arith.constant 1 : i32
    %26 = arith.cmpi eq, %arg2, %c1_i32_12 : i32
    %27 = arith.extui %26 : i1 to i32
    %c0_i32_13 = arith.constant 0 : i32
    %28 = arith.cmpi ne, %27, %c0_i32_13 : i32
    scf.if %28 {
      %c0_14 = arith.constant 0 : index
      %c0_15 = arith.constant 0 : index
      %29 = vector.load %arg9[%c0_14, %c0_15] : memref<16x512xf32, #tpu.memory_space<vmem>>, vector<16x512xf32>
      %c0_16 = arith.constant 0 : index
      %c0_17 = arith.constant 0 : index
      %30 = vector.load %arg8[%c0_16, %c0_17] : memref<16x512xf32, #tpu.memory_space<vmem>>, vector<16x512xf32>
      tpu.vector_store %arg8[%c0_16, %c0_17], %29 {strides = array<i32>} : memref<16x512xf32, #tpu.memory_space<vmem>>, vector<16x512xf32>,
    } else {
    }
    return
  }
  func.func @transform_0(%arg0: i32, %arg1: i32, %arg2: i32, %arg3: memref<2x2xi32, #tpu.memory_space<smem>>) -> (i32, i32) {
    %c0_i32 = arith.constant 0 : i32
    return %arg0, %arg2 : i32, i32
  }
  func.func @transform_1(%arg0: i32, %arg1: i32, %arg2: i32, %arg3: memref<2x2xi32, #tpu.memory_space<smem>>) -> (i32, i32) {
    %c0_i32 = arith.constant 0 : i32
    return %arg2, %arg1 : i32, i32
  }
  func.func @transform_2(%arg0: i32, %arg1: i32, %arg2: i32, %arg3: memref<2x2xi32, #tpu.memory_space<smem>>) -> (i32, i32, i32) {
    %c2_i32 = arith.constant 2 : i32
    %0 = arith.muli %c2_i32, %arg1 : i32
    %c0_i32 = arith.constant 0 : i32
    %1 = arith.addi %0, %c0_i32 : i32
    %2 = arith.index_cast %arg2 : i32 to index
    %3 = arith.index_cast %1 : i32 to index
    %4 = memref.load %arg3[%2, %3] : memref<2x2xi32, #tpu.memory_space<smem>>
    %c1_i32 = arith.constant 1 : i32
    %5 = arith.subi %4, %c1_i32 : i32
    %c0_i32_0 = arith.constant 0 : i32
    %6 = arith.maxsi %5, %c0_i32_0 : i32
    %c0_i32_1 = arith.constant 0 : i32
    %c0_i32_2 = arith.constant 0 : i32
    %c0_i32_3 = arith.constant 0 : i32
    return %6, %c0_i32_1, %c0_i32_2 : i32, i32, i32
  }
  func.func @transform_3(%arg0: i32, %arg1: i32, %arg2: i32, %arg3: memref<2x2xi32, #tpu.memory_space<smem>>) -> (i32, i32, i32) {
    %c2_i32 = arith.constant 2 : i32
    %0 = arith.muli %c2_i32, %arg1 : i32
    %c1_i32 = arith.constant 1 : i32
    %1 = arith.addi %0, %c1_i32 : i32
    %2 = arith.index_cast %arg2 : i32 to index
    %3 = arith.index_cast %1 : i32 to index
    %4 = memref.load %arg3[%2, %3] : memref<2x2xi32, #tpu.memory_space<smem>>
    %c1_i32_0 = arith.constant 1 : i32
    %5 = arith.subi %4, %c1_i32_0 : i32
    %c0_i32 = arith.constant 0 : i32
    %6 = arith.maxsi %5, %c0_i32 : i32
    %c0_i32_1 = arith.constant 0 : i32
    %c0_i32_2 = arith.constant 0 : i32
    %c0_i32_3 = arith.constant 0 : i32
    return %6, %c0_i32_1, %c0_i32_2 : i32, i32, i32
  }
  func.func @transform_4(%arg0: i32, %arg1: i32, %arg2: i32, %arg3: memref<2x2xi32, #tpu.memory_space<smem>>) -> (i32, i32) {
    %c0_i32 = arith.constant 0 : i32
    return %arg0, %arg1 : i32, i32
  }
}

</mosaic_0001>

<bundles_post_ra>
// kernel: linear_matrix_sparsity_forward.1
= control target key start
LH: loop header
LB: loop body
LE: loop exit
PB: predicated region body
PF: predicated region fallthrough
CT: control target
= control target key end

     0   :  { %s2574_s0 = inlined_call_operand.vmem [shape: s32[2,2], index: 0, kind: input, shape index: {}]   ;;  %s2575_s1 = inlined_call_operand.vmem [shape: bf16[16,512], index: 1, kind: input, shape index: {}]   ;;  %s2576_s2 = inlined_call_operand.vmem [shape: bf16[512,512], index: 2, kind: input, shape index: {}]   ;;  %s2577_s3 = inlined_call_operand.vmem [shape: bf16[2,256,256], index: 3, kind: input, shape index: {}, may-alias: {3,4}]   ;;  %s2578_s4 = inlined_call_operand.vmem [shape: bf16[2,256,256], index: 4, kind: input, shape index: {}, may-alias: {3,4}]   ;;  %s2579_s5 = inlined_call_operand.hbm [shape: f32[16,512], index: 5, kind: output, shape index: {}]  }
   0x1   :  { %s10_s20 = sshll.u32 %s2574_s0, 4  ;;  %s11_s20 = int_to_ptr.vmem [resolvable:$true] %s10_s20 }
   0x2   :  { %s2175_s21 = scalar_lea.vmem %s11_s20, 32  ;;  %p2180_p1 = scmp.lt.s32.totalorder %s11_s20, %s11_s20 }
   0x3   :  { %p2176_p0 = scmp.ne.s32.totalorder %s11_s20, %s2175_s21  ;;  %p2181_p2 = scmp.lt.s32.totalorder %s2175_s21, %s2175_s21 }
   0x5   :  { %p2182_p3 = por %p2181_p2, %p2180_p1 }
   0x7   :  { %p2183_p4 = pnand %p2182_p3, %p2176_p0 }
   0x9   :  { %2186 = shalt.err (!%p2183_p4)  }
   0xa   :  { %s2259_s22 = smov [#allocation4]  }
   0xb   :  { %13 = dma.vmem_to_smem %s11_s20, 32, %s2259_s22, [#allocation3] }
   0xc   :  { %2233 = dma.done.wait [#allocation3], 32 }
   0xd   :  { %2234 = vsyncadd [#allocation3], 4294967264 }
   0xe   :  { %15 = sfence }
   0xf   :  { %16 = vsyncpa [#allocation7], 0  ;;  %s2297_s23 = smov 0   ;;  %s2299_s24 = smov 0  }
  0x10   :  { %s2301_s25 = smov 0   ;;  %s2303_s0 = smov 0  }
  0x11   :  { %s2305_s26 = smov 0  }
  0x12 LB: > { %s1739_s27 = sadd.s32 4294967295, %s2257_s26   ;;  %s34_s28 = sadd.s32 1, %s2253_s0  ;;  %s2257_s26 = sphi %s2305_s26, %s22_s26   ;;  %s2253_s0 = sphi %s2303_s0, %s2584_s0   ;;  %s2249_s25 = sphi %s2301_s25, %s2583_s25   ;;  %s2245_s24 = sphi %s2299_s24, %s2582_s24   ;;  %s2241_s23 = sphi %s2297_s23, %s2581_s23  }
  0x13   : > { %p35_p5 = scmp.ge.s32.totalorder %s34_s28, 2  ;;  %p57_p6 = scmp.ne.s32.totalorder %s2245_s24, %s2241_s23 }
  0x14   : > { %p58_p7 = scmp.eq.s32.totalorder %s2257_s26, 0  ;;  %s50_s30 = sadd.s32 1, %s2245_s24 }
  0x15   : > { %s2586_s28 = smov (%p35_p5, %s34_s28), 0  ;;  %p1749_p10 = scmp.ge.s32.totalorder %s2257_s26, 2 }
  0x16   : > { %p59_p8 = por %p58_p7, %p57_p6  ;;  %s46_s29 = ssub.s32 %s2253_s0, %s2586_s28 }
  0x17   : > { %p48_p9 = scmp.eq.s32.totalorder %s46_s29, 0  ;;  %241 = sbr.rel (%p1749_p10) target bundleno = 37 (0x25), region = 16 }
  0x19   : > { %s2333_s6 = scalar_select %p48_p9, %s2245_s24, %s50_s30  }
  0x1e   : > { %244 = sbr.rel (!%p59_p8) target bundleno = 37 (0x25), region = 20  ;;  %s246_s7 = sand.u32 (%p59_p8), 1, %s2245_s24  }
  0x1f   : > { %s1924_s8 = sshll.u32 (%p59_p8), %s2253_s0, 3  ;;  %s1750_s9 = sshll.u32 (%p59_p8), %s246_s7, 4 }
  0x20   : > { %s254_s12 = scalar_lea.vmem (%p59_p8), %s2575_s1, %s1924_s8  ;;  %s248_s13 = scalar_lea.vmem (%p59_p8), [#allocation5], %s1750_s9 }
  0x21   : > { %v284_v0 = vld [vmem:[%s254_s12] sm:$0xff] (%p59_p8)  ;;  %v286_v1 = vld [vmem:[%s254_s12 + $0x10] sm:$0xff] (%p59_p8) }
  0x22   : > { %285 = vst [vmem:[%s248_s13] sm:$0xff] (%p59_p8), %v284_v0  ;;  %287 = vst [vmem:[%s248_s13 + $0x8] sm:$0xff] (%p59_p8), %v286_v1 }
  0x25 PF: > { %p1753_p11 = scmp.ge.s32.totalorder %s2257_s26, 1  ;;  %p373_p12 = scmp.lt.s32.totalorder %s2257_s26, 3 }
  0x27   : > { %p374_p13 = pnand %p1753_p11, %p373_p12 }
  0x28   : > { %s380_s14 = sand.u32 (!%p374_p13), 1, %s2241_s23   ;;  %s1755_s15 = sshll.u32 (!%p374_p13), %s2249_s25, 5 }
  0x29   : > { %377 = sbr.rel (%p374_p13) target bundleno = 1247 (0x4df), region = 70  ;;  %s2345_s16 = sshll.u32 (!%p374_p13), %s380_s14, 4 }
  0x2a   : > { %p449_p0 = scmp.lt.s32.totalorder (!%p374_p13), %s1755_s15, 63  ;;  %s2348_s17 = sshll.u32 (!%p374_p13), %s2249_s25, 7 }
  0x2b   : > { %s467_s18 = sld [smem:[#allocation4 + %s2348_s17]] (!%p374_p13)  ;;  %s496_s19 = sadd.s32 (!%p374_p13), 1, %s2348_s17 }
  0x2c   : > { %s497_s21 = sld [smem:[#allocation4 + %s496_s19]] (!%p374_p13)  ;;  %p1776_p5 = scmp.ne.s32.totalorder (!%p374_p13), %s2249_s25, 0 }
  0x30   : > { %s2588_s15 = smov (!%p449_p0, %s1755_s15), 63  ;;  %v2260_v2 = vmov (!%p1776_p5), 0.0  }
  0x31   : > { %s1925_s20 = sshll.u32 %s2588_s15, 4  ;;  %s1759_s30 = sadd.s32 4294967295, %s467_s18  ;;  %525 = vst [vmem:[#allocation2] sm:$0xff] (!%p1776_p5), %v2260_v2  ;;  %526 = vst [vmem:[#allocation2 + $0x8] sm:$0xff] (!%p1776_p5), %v2260_v2 }
  0x32   : > { %s2357_s23 = scalar_lea.vmem %s2576_s2, %s1925_s20  ;;  %p469_p1 = scmp.gt.s32.totalorder %s1759_s30, 0  ;;  %527 = vst [vmem:[#allocation2 + $0x10] sm:$0xff] (!%p1776_p5), %v2260_v2  ;;  %528 = vst [vmem:[#allocation2 + $0x18] sm:$0xff] (!%p1776_p5), %v2260_v2 }
  0x33   : > { %p1760_p2 = scmp.lt.s32.totalorder %s1759_s30, 1  ;;  %s1768_s7 = sadd.s32 4294967295, %s497_s21  ;;  %529 = vst [vmem:[#allocation2 + $0x20] sm:$0xff] (!%p1776_p5), %v2260_v2  ;;  %530 = vst [vmem:[#allocation2 + $0x28] sm:$0xff] (!%p1776_p5), %v2260_v2 }
  0x34   : > { %s2590_s30 = smov (!%p469_p1, %s1759_s30), 0  ;;  %p499_p3 = scmp.gt.s32.totalorder %s1768_s7, 0  ;;  %531 = vst [vmem:[#allocation2 + $0x30] sm:$0xff] (!%p1776_p5), %v2260_v2  ;;  %532 = vst [vmem:[#allocation2 + $0x38] sm:$0xff] (!%p1776_p5), %v2260_v2 }
  0x35   : > { %p1769_p4 = scmp.lt.s32.totalorder %s1768_s7, 1  ;;  %s2592_s30 = smov (!%p1760_p2, %s2590_s30), 1 }
  0x36   : > { %s2594_s7 = smov (!%p499_p3, %s1768_s7), 0  ;;  %s1928_s8 = sshll.u32 %s2592_s30, 8 }
  0x37   : > { %s2362_s11 = scalar_lea.vmem %s2577_s3, %s1928_s8  ;;  %s2596_s7 = smov (!%p1769_p4, %s2594_s7), 1 }
  0x38   : > { %s1931_s12 = sshll.u32 %s2596_s7, 8  ;;  %s382_s18 = scalar_lea.vmem [#allocation5], %s2345_s16 }
  0x39   : > { %s2367_s15 = scalar_lea.vmem %s2578_s4, %s1931_s12  ;;  %524 = sbr.rel (%p1776_p5) target bundleno = 64 (0x40), region = 78 }
  0x40 PF: > { %v2371_v3 = vld [vmem:[%s382_s18] sm:$0xff]  ;;  %v2373_v4 = vld [vmem:[%s382_s18 + $0x8] sm:$0xff]  ;;  %s2376_s20 = sld [smem:[#allocation4 + %s2348_s17]] }
  0x46   : > { %p1778_p6 = scmp.ne.s32.totalorder %s2376_s20, 0 }
  0x47   : > { %v1983_v5 = vld [vmem:[%s2357_s23 + $0x4] ss:$16 sps:$4 sm:$0xff] (!%p1778_p6)   ;;  %v1780_v6 = vcombine.high (!%p1778_p6), %v2371_v3, %v2373_v4  ;;  %v1985_v7 = vld [vmem:[%s2357_s23] ss:$16 sps:$4 sm:$0xff] (!%p1778_p6)   ;;  %v1779_v38 = vcombine.low (!%p1778_p6), %v2371_v3, %v2373_v4  ;;  %v549_v40 = vld [vmem:[#allocation2 + $0x8] sm:$0xff] (!%p1778_p6) }
  0x48   : > { %547 = sbr.rel (%p1778_p6) target bundleno = 354 (0x162), region = 82  ;;  %754 = vmatprep.subr.bf16.mxu0 (!%p1778_p6), %v1983_v5  ;;  %v1986_v8 = vld [vmem:[%s2357_s23 + $0x24] ss:$16 sps:$4 sm:$0xff] (!%p1778_p6)   ;;  %v1988_v9 = vld [vmem:[%s2357_s23 + $0x20] ss:$16 sps:$4 sm:$0xff] (!%p1778_p6)   ;;  %v551_v45 = vld [vmem:[#allocation2 + $0x28] sm:$0xff] (!%p1778_p6) }
  0x49   : > { %786 = vmatprep.mubr.bf16.mxu0 (!%p1778_p6), %v1780_v6  ;;  %755 = vmatpush1.bf16.msra.mxu0 (!%p1778_p6), %v1985_v7  ;;  %v1989_v10 = vld [vmem:[%s2357_s23 + $0x44] ss:$16 sps:$4 sm:$0xff] (!%p1778_p6)   ;;  %v1991_v11 = vld [vmem:[%s2357_s23 + $0x40] ss:$16 sps:$4 sm:$0xff] (!%p1778_p6)  }
  0x4a   : > { %756 = vmatprep.subr.bf16.mxu0 (!%p1778_p6), %v1986_v8  ;;  %v1992_v12 = vld [vmem:[%s2357_s23 + $0x64] ss:$16 sps:$4 sm:$0xff] (!%p1778_p6)   ;;  %v1994_v13 = vld [vmem:[%s2357_s23 + $0x60] ss:$16 sps:$4 sm:$0xff] (!%p1778_p6)  }
  0x4b   : > { %v1995_v14 = vld [vmem:[%s2357_s23 + $0x84] ss:$16 sps:$4 sm:$0xff] (!%p1778_p6)   ;;  %v1997_v15 = vld [vmem:[%s2357_s23 + $0x80] ss:$16 sps:$4 sm:$0xff] (!%p1778_p6)  }
  0x4c   : > { %v1998_v16 = vld [vmem:[%s2357_s23 + $0xa4] ss:$16 sps:$4 sm:$0xff] (!%p1778_p6)   ;;  %v2000_v17 = vld [vmem:[%s2357_s23 + $0xa0] ss:$16 sps:$4 sm:$0xff] (!%p1778_p6)  }
  0x4d   : > { %757 = vmatpush1.bf16.msra.mxu0 (!%p1778_p6), %v1988_v9  ;;  %v2001_v18 = vld [vmem:[%s2357_s23 + $0xc4] ss:$16 sps:$4 sm:$0xff] (!%p1778_p6)   ;;  %v2003_v19 = vld [vmem:[%s2357_s23 + $0xc0] ss:$16 sps:$4 sm:$0xff] (!%p1778_p6)  }
  0x4e   : > { %758 = vmatprep.subr.bf16.mxu0 (!%p1778_p6), %v1989_v10  ;;  %v2004_v20 = vld [vmem:[%s2357_s23 + $0xe4] ss:$16 sps:$4 sm:$0xff] (!%p1778_p6)   ;;  %v2006_v21 = vld [vmem:[%s2357_s23 + $0xe0] ss:$16 sps:$4 sm:$0xff] (!%p1778_p6)  }
  0x4f   : > { %v2007_v22 = vld [vmem:[%s2357_s23 + $0x104] ss:$16 sps:$4 sm:$0xff]   ;;  %v2009_v23 = vld [vmem:[%s2357_s23 + $0x100] ss:$16 sps:$4 sm:$0xff]  }
  0x50   : > { %v2010_v24 = vld [vmem:[%s2357_s23 + $0x124] ss:$16 sps:$4 sm:$0xff]   ;;  %v2012_v25 = vld [vmem:[%s2357_s23 + $0x120] ss:$16 sps:$4 sm:$0xff]  }
  0x51   : > { %759 = vmatpush1.bf16.msra.mxu0 %v1991_v11  ;;  %v2013_v26 = vld [vmem:[%s2357_s23 + $0x144] ss:$16 sps:$4 sm:$0xff]   ;;  %v2015_v27 = vld [vmem:[%s2357_s23 + $0x140] ss:$16 sps:$4 sm:$0xff]  }
  0x52   : > { %760 = vmatprep.subr.bf16.mxu0 %v1992_v12  ;;  %v2016_v28 = vld [vmem:[%s2357_s23 + $0x164] ss:$16 sps:$4 sm:$0xff]   ;;  %v2018_v29 = vld [vmem:[%s2357_s23 + $0x160] ss:$16 sps:$4 sm:$0xff]  }
  0x53   : > { %v2019_v30 = vld [vmem:[%s2357_s23 + $0x184] ss:$16 sps:$4 sm:$0xff]   ;;  %v2021_v31 = vld [vmem:[%s2357_s23 + $0x180] ss:$16 sps:$4 sm:$0xff]  }
  0x54   : > { %v2022_v32 = vld [vmem:[%s2357_s23 + $0x1a4] ss:$16 sps:$4 sm:$0xff]   ;;  %v2024_v33 = vld [vmem:[%s2357_s23 + $0x1a0] ss:$16 sps:$4 sm:$0xff]  }
  0x55   : > { %761 = vmatpush1.bf16.msra.mxu0 %v1994_v13  ;;  %v2025_v34 = vld [vmem:[%s2357_s23 + $0x1c4] ss:$16 sps:$4 sm:$0xff]   ;;  %v2027_v35 = vld [vmem:[%s2357_s23 + $0x1c0] ss:$16 sps:$4 sm:$0xff]  }
  0x56   : > { %762 = vmatprep.subr.bf16.mxu0 %v1995_v14  ;;  %v2028_v36 = vld [vmem:[%s2357_s23 + $0x1e4] ss:$16 sps:$4 sm:$0xff]   ;;  %v2030_v37 = vld [vmem:[%s2357_s23 + $0x1e0] ss:$16 sps:$4 sm:$0xff]  }
  0x57   : > { %v548_v39 = vld [vmem:[#allocation2] sm:$0xff] }
  0x58   : > { %v550_v42 = vld [vmem:[#allocation2 + $0x20] sm:$0xff] }
  0x59   : > { %763 = vmatpush1.bf16.msra.mxu0 %v1997_v15 }
  0x5a   : > { %764 = vmatprep.subr.bf16.mxu0 %v1998_v16 }
  0x5d   : > { %765 = vmatpush1.bf16.msra.mxu0 %v2000_v17 }
  0x5e   : > { %766 = vmatprep.subr.bf16.mxu0 %v2001_v18 }
  0x61   : > { %767 = vmatpush1.bf16.msra.mxu0 %v2003_v19 }
  0x62   : > { %768 = vmatprep.subr.bf16.mxu0 %v2004_v20 }
  0x65   : > { %769 = vmatpush1.bf16.msra.mxu0 %v2006_v21 }
  0x66   : > { %770 = vmatprep.subr.bf16.mxu0 %v2007_v22 }
  0x69   : > { %771 = vmatpush1.bf16.msra.mxu0 %v2009_v23 }
  0x6a   : > { %772 = vmatprep.subr.bf16.mxu0 %v2010_v24 }
  0x6d   : > { %773 = vmatpush1.bf16.msra.mxu0 %v2012_v25 }
  0x6e   : > { %774 = vmatprep.subr.bf16.mxu0 %v2013_v26 }
  0x71   : > { %775 = vmatpush1.bf16.msra.mxu0 %v2015_v27 }
  0x72   : > { %776 = vmatprep.subr.bf16.mxu0 %v2016_v28 }
  0x75   : > { %777 = vmatpush1.bf16.msra.mxu0 %v2018_v29 }
  0x76   : > { %778 = vmatprep.subr.bf16.mxu0 %v2019_v30 }
  0x79   : > { %779 = vmatpush1.bf16.msra.mxu0 %v2021_v31 }
  0x7a   : > { %780 = vmatprep.subr.bf16.mxu0 %v2022_v32 }
  0x7d   : > { %781 = vmatpush1.bf16.msra.mxu0 %v2024_v33 }
  0x7e   : > { %782 = vmatprep.subr.bf16.mxu0 %v2025_v34 }
  0x81   : > { %783 = vmatpush1.bf16.msra.mxu0 %v2027_v35 }
  0x82   : > { %784 = vmatprep.subr.bf16.mxu0 %v2028_v36 }
  0x85   : > { %785 = vmatpush1.bf16.msra.mxu0 %v2030_v37 }
  0x88   : > { %787 = vmatmul.mubr.bf16.vlgmr.msra.gmra.mrb[0].mxu0 %v1779_v38 }
 0x15b   : > { %v788_v41 = vpop.f32.mrb[0].mxu0 }
 0x15c   : > { %v797_v43 = vadd.f32 %v788_v41, %v548_v39  ;;  %v790_v44 = vpop.f32.mrb[1].mxu0 }
 0x15d   : > { %v798_v46 = vadd.f32 %v790_v44, %v549_v40  ;;  %v792_v47 = vpop.f32.mrb[2].mxu0 }
 0x15e   : > { %801 = vst [vmem:[#allocation2] sm:$0xff] %v797_v43  ;;  %v799_v48 = vadd.f32 %v792_v47, %v550_v42  ;;  %v794_v49 = vpop.f32.mrb[3].mxu0 }
 0x15f   : > { %802 = vst [vmem:[#allocation2 + $0x8] sm:$0xff] %v798_v46  ;;  %v800_v50 = vadd.f32 %v794_v49, %v551_v45 }
 0x160   : > { %803 = vst [vmem:[#allocation2 + $0x20] sm:$0xff] %v799_v48 }
 0x161   : > { %804 = vst [vmem:[#allocation2 + $0x28] sm:$0xff] %v800_v50 }
 0x162 PF: > { %p1813_p7 = scmp.le.s32.totalorder %s2376_s20, 0 }
 0x163   : > { %v2031_v51 = vld [vmem:[%s2362_s11 + $0x4] ss:$8 sps:$4 sm:$0xff] (!%p1813_p7)   ;;  %v1815_v52 = vcombine.high (!%p1813_p7), %v2371_v3, %v2373_v4  ;;  %v2033_v53 = vld [vmem:[%s2362_s11] ss:$8 sps:$4 sm:$0xff] (!%p1813_p7)   ;;  %v2034_v54 = vld [vmem:[%s2362_s11 + $0x14] ss:$8 sps:$4 sm:$0xff] (!%p1813_p7)   ;;  %v1814_v22 = vcombine.low (!%p1813_p7), %v2371_v3, %v2373_v4 }
 0x164   : > { %808 = sbr.rel (%p1813_p7) target bundleno = 638 (0x27e), region = 86  ;;  %1015 = vmatprep.subr.bf16.mxu0 (!%p1813_p7), %v2031_v51  ;;  %v2036_v55 = vld [vmem:[%s2362_s11 + $0x10] ss:$8 sps:$4 sm:$0xff] (!%p1813_p7)   ;;  %v2037_v56 = vld [vmem:[%s2362_s11 + $0x24] ss:$8 sps:$4 sm:$0xff] (!%p1813_p7)  }
 0x165   : > { %1047 = vmatprep.mubr.bf16.mxu0 (!%p1813_p7), %v1815_v52  ;;  %1016 = vmatpush1.bf16.msra.mxu0 (!%p1813_p7), %v2033_v53  ;;  %v2039_v57 = vld [vmem:[%s2362_s11 + $0x20] ss:$8 sps:$4 sm:$0xff] (!%p1813_p7)   ;;  %v2040_v58 = vld [vmem:[%s2362_s11 + $0x34] ss:$8 sps:$4 sm:$0xff] (!%p1813_p7)   ;;  %v2042_v59 = vld [vmem:[%s2362_s11 + $0x30] ss:$8 sps:$4 sm:$0xff] (!%p1813_p7)  }
 0x166   : > { %1017 = vmatprep.subr.bf16.mxu0 (!%p1813_p7), %v2034_v54  ;;  %v2043_v60 = vld [vmem:[%s2362_s11 + $0x44] ss:$8 sps:$4 sm:$0xff] (!%p1813_p7)   ;;  %v2045_v61 = vld [vmem:[%s2362_s11 + $0x40] ss:$8 sps:$4 sm:$0xff] (!%p1813_p7)   ;;  %v2046_v62 = vld [vmem:[%s2362_s11 + $0x54] ss:$8 sps:$4 sm:$0xff] (!%p1813_p7)  }
 0x167   : > { %v2048_v63 = vld [vmem:[%s2362_s11 + $0x50] ss:$8 sps:$4 sm:$0xff] (!%p1813_p7)   ;;  %v2049_v0 = vld [vmem:[%s2362_s11 + $0x64] ss:$8 sps:$4 sm:$0xff] (!%p1813_p7)   ;;  %v2051_v1 = vld [vmem:[%s2362_s11 + $0x60] ss:$8 sps:$4 sm:$0xff] (!%p1813_p7)  }
 0x168   : > { %v2052_v2 = vld [vmem:[%s2362_s11 + $0x74] ss:$8 sps:$4 sm:$0xff] (!%p1813_p7)   ;;  %v2054_v5 = vld [vmem:[%s2362_s11 + $0x70] ss:$8 sps:$4 sm:$0xff] (!%p1813_p7)   ;;  %v2055_v6 = vld [vmem:[%s2362_s11 + $0x84] ss:$8 sps:$4 sm:$0xff] (!%p1813_p7)  }
 0x169   : > { %1018 = vmatpush1.bf16.msra.mxu0 (!%p1813_p7), %v2036_v55  ;;  %v2057_v7 = vld [vmem:[%s2362_s11 + $0x80] ss:$8 sps:$4 sm:$0xff] (!%p1813_p7)   ;;  %v2058_v8 = vld [vmem:[%s2362_s11 + $0x94] ss:$8 sps:$4 sm:$0xff] (!%p1813_p7)   ;;  %v2060_v9 = vld [vmem:[%s2362_s11 + $0x90] ss:$8 sps:$4 sm:$0xff] (!%p1813_p7)  }
 0x16a   : > { %1019 = vmatprep.subr.bf16.mxu0 (!%p1813_p7), %v2037_v56  ;;  %v2061_v10 = vld [vmem:[%s2362_s11 + $0xa4] ss:$8 sps:$4 sm:$0xff] (!%p1813_p7)   ;;  %v2063_v11 = vld [vmem:[%s2362_s11 + $0xa0] ss:$8 sps:$4 sm:$0xff] (!%p1813_p7)   ;;  %v2064_v12 = vld [vmem:[%s2362_s11 + $0xb4] ss:$8 sps:$4 sm:$0xff] (!%p1813_p7)  }
 0x16b   : > { %v2066_v13 = vld [vmem:[%s2362_s11 + $0xb0] ss:$8 sps:$4 sm:$0xff]   ;;  %v2067_v14 = vld [vmem:[%s2362_s11 + $0xc4] ss:$8 sps:$4 sm:$0xff]   ;;  %v2069_v15 = vld [vmem:[%s2362_s11 + $0xc0] ss:$8 sps:$4 sm:$0xff]  }
 0x16c   : > { %v2070_v16 = vld [vmem:[%s2362_s11 + $0xd4] ss:$8 sps:$4 sm:$0xff]   ;;  %v2072_v17 = vld [vmem:[%s2362_s11 + $0xd0] ss:$8 sps:$4 sm:$0xff]   ;;  %v2073_v18 = vld [vmem:[%s2362_s11 + $0xe4] ss:$8 sps:$4 sm:$0xff]  }
 0x16d   : > { %1020 = vmatpush1.bf16.msra.mxu0 %v2039_v57  ;;  %v2075_v19 = vld [vmem:[%s2362_s11 + $0xe0] ss:$8 sps:$4 sm:$0xff]   ;;  %v2076_v20 = vld [vmem:[%s2362_s11 + $0xf4] ss:$8 sps:$4 sm:$0xff]   ;;  %v2078_v21 = vld [vmem:[%s2362_s11 + $0xf0] ss:$8 sps:$4 sm:$0xff]  }
 0x16e   : > { %1021 = vmatprep.subr.bf16.mxu0 %v2040_v58  ;;  %v809_v23 = vld [vmem:[#allocation2] sm:$0xff]  ;;  %v810_v24 = vld [vmem:[#allocation2 + $0x8] sm:$0xff] }
 0x16f   : > { %v811_v26 = vld [vmem:[#allocation2 + $0x20] sm:$0xff]  ;;  %v812_v29 = vld [vmem:[#allocation2 + $0x28] sm:$0xff] }
 0x171   : > { %1022 = vmatpush1.bf16.msra.mxu0 %v2042_v59 }
 0x172   : > { %1023 = vmatprep.subr.bf16.mxu0 %v2043_v60 }
 0x175   : > { %1024 = vmatpush1.bf16.msra.mxu0 %v2045_v61 }
 0x176   : > { %1025 = vmatprep.subr.bf16.mxu0 %v2046_v62 }
 0x179   : > { %1026 = vmatpush1.bf16.msra.mxu0 %v2048_v63 }
 0x17a   : > { %1027 = vmatprep.subr.bf16.mxu0 %v2049_v0 }
 0x17d   : > { %1028 = vmatpush1.bf16.msra.mxu0 %v2051_v1 }
 0x17e   : > { %1029 = vmatprep.subr.bf16.mxu0 %v2052_v2 }
 0x181   : > { %1030 = vmatpush1.bf16.msra.mxu0 %v2054_v5 }
 0x182   : > { %1031 = vmatprep.subr.bf16.mxu0 %v2055_v6 }
 0x185   : > { %1032 = vmatpush1.bf16.msra.mxu0 %v2057_v7 }
 0x186   : > { %1033 = vmatprep.subr.bf16.mxu0 %v2058_v8 }
 0x189   : > { %1034 = vmatpush1.bf16.msra.mxu0 %v2060_v9 }
 0x18a   : > { %1035 = vmatprep.subr.bf16.mxu0 %v2061_v10 }
 0x18d   : > { %1036 = vmatpush1.bf16.msra.mxu0 %v2063_v11 }
 0x18e   : > { %1037 = vmatprep.subr.bf16.mxu0 %v2064_v12 }
 0x191   : > { %1038 = vmatpush1.bf16.msra.mxu0 %v2066_v13 }
 0x192   : > { %1039 = vmatprep.subr.bf16.mxu0 %v2067_v14 }
 0x195   : > { %1040 = vmatpush1.bf16.msra.mxu0 %v2069_v15 }
 0x196   : > { %1041 = vmatprep.subr.bf16.mxu0 %v2070_v16 }
 0x199   : > { %1042 = vmatpush1.bf16.msra.mxu0 %v2072_v17 }
 0x19a   : > { %1043 = vmatprep.subr.bf16.mxu0 %v2073_v18 }
 0x19d   : > { %1044 = vmatpush1.bf16.msra.mxu0 %v2075_v19 }
 0x19e   : > { %1045 = vmatprep.subr.bf16.mxu0 %v2076_v20 }
 0x1a1   : > { %1046 = vmatpush1.bf16.msra.mxu0 %v2078_v21 }
 0x1a4   : > { %1048 = vmatmul.mubr.bf16.vlgmr.msra.gmra.mrb[0].mxu0 %v1814_v22 }
 0x277   : > { %v1049_v25 = vpop.f32.mrb[0].mxu0 }
 0x278   : > { %v1058_v27 = vadd.f32 %v1049_v25, %v809_v23  ;;  %v1051_v28 = vpop.f32.mrb[1].mxu0 }
 0x279   : > { %v1059_v30 = vadd.f32 %v1051_v28, %v810_v24  ;;  %v1053_v31 = vpop.f32.mrb[2].mxu0 }
 0x27a   : > { %1062 = vst [vmem:[#allocation2] sm:$0xff] %v1058_v27  ;;  %v1060_v32 = vadd.f32 %v1053_v31, %v811_v26  ;;  %v1055_v33 = vpop.f32.mrb[3].mxu0 }
 0x27b   : > { %1063 = vst [vmem:[#allocation2 + $0x8] sm:$0xff] %v1059_v30  ;;  %v1061_v34 = vadd.f32 %v1055_v33, %v812_v29 }
 0x27c   : > { %1064 = vst [vmem:[#allocation2 + $0x20] sm:$0xff] %v1060_v32 }
 0x27d   : > { %1065 = vst [vmem:[#allocation2 + $0x28] sm:$0xff] %v1061_v34 }
 0x27e PF: > { %s2454_s16 = sld [smem:[#allocation4 + %s496_s19]] }
 0x284   : > { %p1849_p8 = scmp.ne.s32.totalorder %s2454_s16, 0 }
 0x285   : > { %v2079_v35 = vld [vmem:[%s2357_s23 + $0xc] ss:$16 sps:$4 sm:$0xff] (!%p1849_p8)   ;;  %v1851_v36 = vcombine.high (!%p1849_p8), %v2371_v3, %v2373_v4  ;;  %v2081_v37 = vld [vmem:[%s2357_s23 + $0x8] ss:$16 sps:$4 sm:$0xff] (!%p1849_p8)   ;;  %v1850_v6 = vcombine.low (!%p1849_p8), %v2371_v3, %v2373_v4  ;;  %v1079_v7 = vld [vmem:[#allocation2 + $0x10] sm:$0xff] (!%p1849_p8) }
 0x286   : > { %1078 = sbr.rel (%p1849_p8) target bundleno = 928 (0x3a0), region = 90  ;;  %1285 = vmatprep.subr.bf16.mxu0 (!%p1849_p8), %v2079_v35  ;;  %v2082_v38 = vld [vmem:[%s2357_s23 + $0x2c] ss:$16 sps:$4 sm:$0xff] (!%p1849_p8)   ;;  %v2084_v39 = vld [vmem:[%s2357_s23 + $0x28] ss:$16 sps:$4 sm:$0xff] (!%p1849_p8)   ;;  %v1081_v10 = vld [vmem:[#allocation2 + $0x30] sm:$0xff] (!%p1849_p8) }
 0x287   : > { %1317 = vmatprep.mubr.bf16.mxu0 (!%p1849_p8), %v1851_v36  ;;  %1286 = vmatpush1.bf16.msra.mxu0 (!%p1849_p8), %v2081_v37  ;;  %v2085_v40 = vld [vmem:[%s2357_s23 + $0x4c] ss:$16 sps:$4 sm:$0xff] (!%p1849_p8)   ;;  %v2087_v41 = vld [vmem:[%s2357_s23 + $0x48] ss:$16 sps:$4 sm:$0xff] (!%p1849_p8)  }
 0x288   : > { %1287 = vmatprep.subr.bf16.mxu0 (!%p1849_p8), %v2082_v38  ;;  %v2088_v42 = vld [vmem:[%s2357_s23 + $0x6c] ss:$16 sps:$4 sm:$0xff] (!%p1849_p8)   ;;  %v2090_v43 = vld [vmem:[%s2357_s23 + $0x68] ss:$16 sps:$4 sm:$0xff] (!%p1849_p8)  }
 0x289   : > { %v2091_v44 = vld [vmem:[%s2357_s23 + $0x8c] ss:$16 sps:$4 sm:$0xff] (!%p1849_p8)   ;;  %v2093_v45 = vld [vmem:[%s2357_s23 + $0x88] ss:$16 sps:$4 sm:$0xff] (!%p1849_p8)  }
 0x28a   : > { %v2094_v46 = vld [vmem:[%s2357_s23 + $0xac] ss:$16 sps:$4 sm:$0xff] (!%p1849_p8)   ;;  %v2096_v47 = vld [vmem:[%s2357_s23 + $0xa8] ss:$16 sps:$4 sm:$0xff] (!%p1849_p8)  }
 0x28b   : > { %1288 = vmatpush1.bf16.msra.mxu0 (!%p1849_p8), %v2084_v39  ;;  %v2097_v48 = vld [vmem:[%s2357_s23 + $0xcc] ss:$16 sps:$4 sm:$0xff] (!%p1849_p8)   ;;  %v2099_v49 = vld [vmem:[%s2357_s23 + $0xc8] ss:$16 sps:$4 sm:$0xff] (!%p1849_p8)  }
 0x28c   : > { %1289 = vmatprep.subr.bf16.mxu0 (!%p1849_p8), %v2085_v40  ;;  %v2100_v50 = vld [vmem:[%s2357_s23 + $0xec] ss:$16 sps:$4 sm:$0xff] (!%p1849_p8)   ;;  %v2102_v51 = vld [vmem:[%s2357_s23 + $0xe8] ss:$16 sps:$4 sm:$0xff] (!%p1849_p8)  }
 0x28d   : > { %v2103_v52 = vld [vmem:[%s2357_s23 + $0x10c] ss:$16 sps:$4 sm:$0xff]   ;;  %v2105_v53 = vld [vmem:[%s2357_s23 + $0x108] ss:$16 sps:$4 sm:$0xff]  }
 0x28e   : > { %v2106_v54 = vld [vmem:[%s2357_s23 + $0x12c] ss:$16 sps:$4 sm:$0xff]   ;;  %v2108_v55 = vld [vmem:[%s2357_s23 + $0x128] ss:$16 sps:$4 sm:$0xff]  }
 0x28f   : > { %1290 = vmatpush1.bf16.msra.mxu0 %v2087_v41  ;;  %v2109_v56 = vld [vmem:[%s2357_s23 + $0x14c] ss:$16 sps:$4 sm:$0xff]   ;;  %v2111_v57 = vld [vmem:[%s2357_s23 + $0x148] ss:$16 sps:$4 sm:$0xff]  }
 0x290   : > { %1291 = vmatprep.subr.bf16.mxu0 %v2088_v42  ;;  %v2112_v58 = vld [vmem:[%s2357_s23 + $0x16c] ss:$16 sps:$4 sm:$0xff]   ;;  %v2114_v59 = vld [vmem:[%s2357_s23 + $0x168] ss:$16 sps:$4 sm:$0xff]  }
 0x291   : > { %v2115_v60 = vld [vmem:[%s2357_s23 + $0x18c] ss:$16 sps:$4 sm:$0xff]   ;;  %v2117_v61 = vld [vmem:[%s2357_s23 + $0x188] ss:$16 sps:$4 sm:$0xff]  }
 0x292   : > { %v2118_v62 = vld [vmem:[%s2357_s23 + $0x1ac] ss:$16 sps:$4 sm:$0xff]   ;;  %v2120_v63 = vld [vmem:[%s2357_s23 + $0x1a8] ss:$16 sps:$4 sm:$0xff]  }
 0x293   : > { %1292 = vmatpush1.bf16.msra.mxu0 %v2090_v43  ;;  %v2121_v0 = vld [vmem:[%s2357_s23 + $0x1cc] ss:$16 sps:$4 sm:$0xff]   ;;  %v2123_v1 = vld [vmem:[%s2357_s23 + $0x1c8] ss:$16 sps:$4 sm:$0xff]  }
 0x294   : > { %1293 = vmatprep.subr.bf16.mxu0 %v2091_v44  ;;  %v2124_v2 = vld [vmem:[%s2357_s23 + $0x1ec] ss:$16 sps:$4 sm:$0xff]   ;;  %v2126_v5 = vld [vmem:[%s2357_s23 + $0x1e8] ss:$16 sps:$4 sm:$0xff]  }
 0x295   : > { %v1080_v8 = vld [vmem:[#allocation2 + $0x18] sm:$0xff] }
 0x296   : > { %v1082_v13 = vld [vmem:[#allocation2 + $0x38] sm:$0xff] }
 0x297   : > { %1294 = vmatpush1.bf16.msra.mxu0 %v2093_v45 }
 0x298   : > { %1295 = vmatprep.subr.bf16.mxu0 %v2094_v46 }
 0x29b   : > { %1296 = vmatpush1.bf16.msra.mxu0 %v2096_v47 }
 0x29c   : > { %1297 = vmatprep.subr.bf16.mxu0 %v2097_v48 }
 0x29f   : > { %1298 = vmatpush1.bf16.msra.mxu0 %v2099_v49 }
 0x2a0   : > { %1299 = vmatprep.subr.bf16.mxu0 %v2100_v50 }
 0x2a3   : > { %1300 = vmatpush1.bf16.msra.mxu0 %v2102_v51 }
 0x2a4   : > { %1301 = vmatprep.subr.bf16.mxu0 %v2103_v52 }
 0x2a7   : > { %1302 = vmatpush1.bf16.msra.mxu0 %v2105_v53 }
 0x2a8   : > { %1303 = vmatprep.subr.bf16.mxu0 %v2106_v54 }
 0x2ab   : > { %1304 = vmatpush1.bf16.msra.mxu0 %v2108_v55 }
 0x2ac   : > { %1305 = vmatprep.subr.bf16.mxu0 %v2109_v56 }
 0x2af   : > { %1306 = vmatpush1.bf16.msra.mxu0 %v2111_v57 }
 0x2b0   : > { %1307 = vmatprep.subr.bf16.mxu0 %v2112_v58 }
 0x2b3   : > { %1308 = vmatpush1.bf16.msra.mxu0 %v2114_v59 }
 0x2b4   : > { %1309 = vmatprep.subr.bf16.mxu0 %v2115_v60 }
 0x2b7   : > { %1310 = vmatpush1.bf16.msra.mxu0 %v2117_v61 }
 0x2b8   : > { %1311 = vmatprep.subr.bf16.mxu0 %v2118_v62 }
 0x2bb   : > { %1312 = vmatpush1.bf16.msra.mxu0 %v2120_v63 }
 0x2bc   : > { %1313 = vmatprep.subr.bf16.mxu0 %v2121_v0 }
 0x2bf   : > { %1314 = vmatpush1.bf16.msra.mxu0 %v2123_v1 }
 0x2c0   : > { %1315 = vmatprep.subr.bf16.mxu0 %v2124_v2 }
 0x2c3   : > { %1316 = vmatpush1.bf16.msra.mxu0 %v2126_v5 }
 0x2c6   : > { %1318 = vmatmul.mubr.bf16.vlgmr.msra.gmra.mrb[0].mxu0 %v1850_v6 }
 0x399   : > { %v1319_v9 = vpop.f32.mrb[0].mxu0 }
 0x39a   : > { %v1328_v11 = vadd.f32 %v1319_v9, %v1079_v7  ;;  %v1321_v12 = vpop.f32.mrb[1].mxu0 }
 0x39b   : > { %v1329_v14 = vadd.f32 %v1321_v12, %v1080_v8  ;;  %v1323_v15 = vpop.f32.mrb[2].mxu0 }
 0x39c   : > { %1332 = vst [vmem:[#allocation2 + $0x10] sm:$0xff] %v1328_v11  ;;  %v1330_v16 = vadd.f32 %v1323_v15, %v1081_v10  ;;  %v1325_v17 = vpop.f32.mrb[3].mxu0 }
 0x39d   : > { %1333 = vst [vmem:[#allocation2 + $0x18] sm:$0xff] %v1329_v14  ;;  %v1331_v18 = vadd.f32 %v1325_v17, %v1082_v13 }
 0x39e   : > { %1334 = vst [vmem:[#allocation2 + $0x30] sm:$0xff] %v1330_v16 }
 0x39f   : > { %1335 = vst [vmem:[#allocation2 + $0x38] sm:$0xff] %v1331_v18 }
 0x3a0 PF: > { %p1884_p9 = scmp.le.s32.totalorder %s2454_s16, 0 }
 0x3a1   : > { %v2127_v19 = vld [vmem:[%s2367_s15 + $0x4] ss:$8 sps:$4 sm:$0xff] (!%p1884_p9)   ;;  %v1886_v20 = vcombine.high (!%p1884_p9), %v2371_v3, %v2373_v4  ;;  %v2129_v21 = vld [vmem:[%s2367_s15] ss:$8 sps:$4 sm:$0xff] (!%p1884_p9)   ;;  %v2130_v22 = vld [vmem:[%s2367_s15 + $0x14] ss:$8 sps:$4 sm:$0xff] (!%p1884_p9)   ;;  %v1885_v52 = vcombine.low (!%p1884_p9), %v2371_v3, %v2373_v4 }
 0x3a2   : > { %1339 = sbr.rel (%p1884_p9) target bundleno = 1212 (0x4bc), region = 94  ;;  %1546 = vmatprep.subr.bf16.mxu0 (!%p1884_p9), %v2127_v19  ;;  %v2132_v23 = vld [vmem:[%s2367_s15 + $0x10] ss:$8 sps:$4 sm:$0xff] (!%p1884_p9)   ;;  %v2133_v24 = vld [vmem:[%s2367_s15 + $0x24] ss:$8 sps:$4 sm:$0xff] (!%p1884_p9)  }
 0x3a3   : > { %1578 = vmatprep.mubr.bf16.mxu0 (!%p1884_p9), %v1886_v20  ;;  %1547 = vmatpush1.bf16.msra.mxu0 (!%p1884_p9), %v2129_v21  ;;  %v2135_v25 = vld [vmem:[%s2367_s15 + $0x20] ss:$8 sps:$4 sm:$0xff] (!%p1884_p9)   ;;  %v2136_v26 = vld [vmem:[%s2367_s15 + $0x34] ss:$8 sps:$4 sm:$0xff] (!%p1884_p9)   ;;  %v2138_v27 = vld [vmem:[%s2367_s15 + $0x30] ss:$8 sps:$4 sm:$0xff] (!%p1884_p9)  }
 0x3a4   : > { %1548 = vmatprep.subr.bf16.mxu0 (!%p1884_p9), %v2130_v22  ;;  %v2139_v28 = vld [vmem:[%s2367_s15 + $0x44] ss:$8 sps:$4 sm:$0xff] (!%p1884_p9)   ;;  %v2141_v29 = vld [vmem:[%s2367_s15 + $0x40] ss:$8 sps:$4 sm:$0xff] (!%p1884_p9)   ;;  %v2142_v30 = vld [vmem:[%s2367_s15 + $0x54] ss:$8 sps:$4 sm:$0xff] (!%p1884_p9)  }
 0x3a5   : > { %v2144_v31 = vld [vmem:[%s2367_s15 + $0x50] ss:$8 sps:$4 sm:$0xff] (!%p1884_p9)   ;;  %v2145_v32 = vld [vmem:[%s2367_s15 + $0x64] ss:$8 sps:$4 sm:$0xff] (!%p1884_p9)   ;;  %v2147_v33 = vld [vmem:[%s2367_s15 + $0x60] ss:$8 sps:$4 sm:$0xff] (!%p1884_p9)  }
 0x3a6   : > { %v2148_v34 = vld [vmem:[%s2367_s15 + $0x74] ss:$8 sps:$4 sm:$0xff] (!%p1884_p9)   ;;  %v2150_v35 = vld [vmem:[%s2367_s15 + $0x70] ss:$8 sps:$4 sm:$0xff] (!%p1884_p9)   ;;  %v2151_v36 = vld [vmem:[%s2367_s15 + $0x84] ss:$8 sps:$4 sm:$0xff] (!%p1884_p9)  }
 0x3a7   : > { %1549 = vmatpush1.bf16.msra.mxu0 (!%p1884_p9), %v2132_v23  ;;  %v2153_v37 = vld [vmem:[%s2367_s15 + $0x80] ss:$8 sps:$4 sm:$0xff] (!%p1884_p9)   ;;  %v2154_v38 = vld [vmem:[%s2367_s15 + $0x94] ss:$8 sps:$4 sm:$0xff] (!%p1884_p9)   ;;  %v2156_v39 = vld [vmem:[%s2367_s15 + $0x90] ss:$8 sps:$4 sm:$0xff] (!%p1884_p9)  }
 0x3a8   : > { %1550 = vmatprep.subr.bf16.mxu0 (!%p1884_p9), %v2133_v24  ;;  %v2157_v40 = vld [vmem:[%s2367_s15 + $0xa4] ss:$8 sps:$4 sm:$0xff] (!%p1884_p9)   ;;  %v2159_v41 = vld [vmem:[%s2367_s15 + $0xa0] ss:$8 sps:$4 sm:$0xff] (!%p1884_p9)   ;;  %v2160_v42 = vld [vmem:[%s2367_s15 + $0xb4] ss:$8 sps:$4 sm:$0xff] (!%p1884_p9)  }
 0x3a9   : > { %v2162_v43 = vld [vmem:[%s2367_s15 + $0xb0] ss:$8 sps:$4 sm:$0xff]   ;;  %v2163_v44 = vld [vmem:[%s2367_s15 + $0xc4] ss:$8 sps:$4 sm:$0xff]   ;;  %v2165_v45 = vld [vmem:[%s2367_s15 + $0xc0] ss:$8 sps:$4 sm:$0xff]  }
 0x3aa   : > { %v2166_v46 = vld [vmem:[%s2367_s15 + $0xd4] ss:$8 sps:$4 sm:$0xff]   ;;  %v2168_v47 = vld [vmem:[%s2367_s15 + $0xd0] ss:$8 sps:$4 sm:$0xff]   ;;  %v2169_v48 = vld [vmem:[%s2367_s15 + $0xe4] ss:$8 sps:$4 sm:$0xff]  }
 0x3ab   : > { %1551 = vmatpush1.bf16.msra.mxu0 %v2135_v25  ;;  %v2171_v49 = vld [vmem:[%s2367_s15 + $0xe0] ss:$8 sps:$4 sm:$0xff]   ;;  %v2172_v50 = vld [vmem:[%s2367_s15 + $0xf4] ss:$8 sps:$4 sm:$0xff]   ;;  %v2174_v51 = vld [vmem:[%s2367_s15 + $0xf0] ss:$8 sps:$4 sm:$0xff]  }
 0x3ac   : > { %1552 = vmatprep.subr.bf16.mxu0 %v2136_v26  ;;  %v1340_v53 = vld [vmem:[#allocation2 + $0x10] sm:$0xff]  ;;  %v1341_v54 = vld [vmem:[#allocation2 + $0x18] sm:$0xff] }
 0x3ad   : > { %v1342_v56 = vld [vmem:[#allocation2 + $0x30] sm:$0xff]  ;;  %v1343_v59 = vld [vmem:[#allocation2 + $0x38] sm:$0xff] }
 0x3af   : > { %1553 = vmatpush1.bf16.msra.mxu0 %v2138_v27 }
 0x3b0   : > { %1554 = vmatprep.subr.bf16.mxu0 %v2139_v28 }
 0x3b3   : > { %1555 = vmatpush1.bf16.msra.mxu0 %v2141_v29 }
 0x3b4   : > { %1556 = vmatprep.subr.bf16.mxu0 %v2142_v30 }
 0x3b7   : > { %1557 = vmatpush1.bf16.msra.mxu0 %v2144_v31 }
 0x3b8   : > { %1558 = vmatprep.subr.bf16.mxu0 %v2145_v32 }
 0x3bb   : > { %1559 = vmatpush1.bf16.msra.mxu0 %v2147_v33 }
 0x3bc   : > { %1560 = vmatprep.subr.bf16.mxu0 %v2148_v34 }
 0x3bf   : > { %1561 = vmatpush1.bf16.msra.mxu0 %v2150_v35 }
 0x3c0   : > { %1562 = vmatprep.subr.bf16.mxu0 %v2151_v36 }
 0x3c3   : > { %1563 = vmatpush1.bf16.msra.mxu0 %v2153_v37 }
 0x3c4   : > { %1564 = vmatprep.subr.bf16.mxu0 %v2154_v38 }
 0x3c7   : > { %1565 = vmatpush1.bf16.msra.mxu0 %v2156_v39 }
 0x3c8   : > { %1566 = vmatprep.subr.bf16.mxu0 %v2157_v40 }
 0x3cb   : > { %1567 = vmatpush1.bf16.msra.mxu0 %v2159_v41 }
 0x3cc   : > { %1568 = vmatprep.subr.bf16.mxu0 %v2160_v42 }
 0x3cf   : > { %1569 = vmatpush1.bf16.msra.mxu0 %v2162_v43 }
 0x3d0   : > { %1570 = vmatprep.subr.bf16.mxu0 %v2163_v44 }
 0x3d3   : > { %1571 = vmatpush1.bf16.msra.mxu0 %v2165_v45 }
 0x3d4   : > { %1572 = vmatprep.subr.bf16.mxu0 %v2166_v46 }
 0x3d7   : > { %1573 = vmatpush1.bf16.msra.mxu0 %v2168_v47 }
 0x3d8   : > { %1574 = vmatprep.subr.bf16.mxu0 %v2169_v48 }
 0x3db   : > { %1575 = vmatpush1.bf16.msra.mxu0 %v2171_v49 }
 0x3dc   : > { %1576 = vmatprep.subr.bf16.mxu0 %v2172_v50 }
 0x3df   : > { %1577 = vmatpush1.bf16.msra.mxu0 %v2174_v51 }
 0x3e2   : > { %1579 = vmatmul.mubr.bf16.vlgmr.msra.gmra.mrb[0].mxu0 %v1885_v52 }
 0x4b5   : > { %v1580_v55 = vpop.f32.mrb[0].mxu0 }
 0x4b6   : > { %v1589_v57 = vadd.f32 %v1580_v55, %v1340_v53  ;;  %v1582_v58 = vpop.f32.mrb[1].mxu0 }
 0x4b7   : > { %v1590_v60 = vadd.f32 %v1582_v58, %v1341_v54  ;;  %v1584_v61 = vpop.f32.mrb[2].mxu0 }
 0x4b8   : > { %1593 = vst [vmem:[#allocation2 + $0x10] sm:$0xff] %v1589_v57  ;;  %v1591_v62 = vadd.f32 %v1584_v61, %v1342_v56  ;;  %v1586_v63 = vpop.f32.mrb[3].mxu0 }
 0x4b9   : > { %1594 = vst [vmem:[#allocation2 + $0x18] sm:$0xff] %v1590_v60  ;;  %v1592_v0 = vadd.f32 %v1586_v63, %v1343_v59 }
 0x4ba   : > { %1595 = vst [vmem:[#allocation2 + $0x30] sm:$0xff] %v1591_v62 }
 0x4bb   : > { %1596 = vst [vmem:[#allocation2 + $0x38] sm:$0xff] %v1592_v0 }
 0x4bc PF: > { %p1919_p10 = scmp.ne.s32.totalorder %s2249_s25, 1 }
 0x4bd   : > { %v1601_v3 = vld [vmem:[#allocation2] sm:$0xff] (!%p1919_p10)  ;;  %v1602_v4 = vld [vmem:[#allocation2 + $0x8] sm:$0xff] (!%p1919_p10) }
 0x4be   : > { %1600 = sbr.rel (%p1919_p10) target bundleno = 1221 (0x4c5), region = 98  ;;  %1609 = vst [vmem:[#allocation6] sm:$0xff] (!%p1919_p10), %v1601_v3  ;;  %1610 = vst [vmem:[#allocation6 + $0x8] sm:$0xff] (!%p1919_p10), %v1602_v4  ;;  %v1605_v5 = vld [vmem:[#allocation2 + $0x20] sm:$0xff] (!%p1919_p10)  ;;  %v1606_v6 = vld [vmem:[#allocation2 + $0x28] sm:$0xff] (!%p1919_p10) }
 0x4bf   : > { %v1603_v1 = vld [vmem:[#allocation2 + $0x10] sm:$0xff] (!%p1919_p10)  ;;  %1613 = vst [vmem:[#allocation6 + $0x20] sm:$0xff] (!%p1919_p10), %v1605_v5  ;;  %1614 = vst [vmem:[#allocation6 + $0x28] sm:$0xff] (!%p1919_p10), %v1606_v6 }
 0x4c0   : > { %1611 = vst [vmem:[#allocation6 + $0x10] sm:$0xff] (!%p1919_p10), %v1603_v1  ;;  %v1604_v2 = vld [vmem:[#allocation2 + $0x18] sm:$0xff] (!%p1919_p10) }
 0x4c1   : > { %1612 = vst [vmem:[#allocation6 + $0x18] sm:$0xff] (!%p1919_p10), %v1604_v2  ;;  %v1607_v7 = vld [vmem:[#allocation2 + $0x30] sm:$0xff] (!%p1919_p10) }
 0x4c2   : > { %v1608_v8 = vld [vmem:[#allocation2 + $0x38] sm:$0xff] (!%p1919_p10)  ;;  %1615 = vst [vmem:[#allocation6 + $0x30] sm:$0xff] (!%p1919_p10), %v1607_v7 }
 0x4c3   : > { %1616 = vst [vmem:[#allocation6 + $0x38] sm:$0xff] (!%p1919_p10), %v1608_v8 }
 0x4c5 PF: > { %p2533_p11 = scmp.eq.s32.totalorder %s1739_s27, 1  ;;  %s2261_s17 = smov [#allocation6]  }
 0x4c6   : > { %s1629_s19 = sshll.u32 %s2261_s17, 4  ;;  %s1630_s19 = int_to_ptr.vmem [resolvable:$true] %s1629_s19 }
 0x4c7   : > { %s2187_s21 = scalar_lea.vmem %s1630_s19, 1024  ;;  %p2194_p1 = scmp.lt.s32.totalorder %s1630_s19, %s1630_s19 }
 0x4c8   : > { %p2188_p12 = scmp.ne.s32.totalorder %s1630_s19, %s2187_s21  ;;  %p2195_p2 = scmp.lt.s32.totalorder %s2187_s21, %s2187_s21 }
 0x4ca   : > { %p2189_p13 = pnand %p2188_p12, %p2533_p11  ;;  %p2196_p3 = por %p2195_p2, %p2194_p1 }
 0x4cc   : > { %p2190_p0 = pneg %p2189_p13 }
 0x4ce   : > { %p2197_p4 = pnand %p2196_p3, %p2190_p0 }
 0x4d0   : > { %2200 = shalt.err (!%p2197_p4)
}
 0x4d1   : > { %s2201_s27 = scalar_lea.hbm %s2579_s5, 1024 }
 0x4d2   : > { %p2202_p5 = scmp.ne.s32.totalorder %s2579_s5, %s2201_s27  ;;  %p2207_p8 = scmp.lt.u32.totalorder %s2201_s27, %s2579_s5 }
 0x4d4   : > { %p2203_p6 = pnand %p2202_p5, %p2533_p11 }
 0x4d6   : > { %p2204_p7 = pneg %p2203_p6 }
 0x4d8   : > { %p2209_p9 = pnand %p2207_p8, %p2204_p7 }
 0x4da   : > { %2212 = shalt.err (!%p2209_p9)
}
 0x4db   : > { %s2262_s9 = smov 512   ;;  %s2263_s10 = smov 32  }
 0x4dc   : > { %1933 = dma.vmem_to_hbm [thread:$0]  (%p2533_p11), %s1630_s19, 1024, %s2579_s5, [#allocation7], %s2262_s9, %s2262_s9, %s2263_s10  }
 0x4dd   : > { %2236 = dma.done.wait (%p2533_p11), [#allocation7], 1024  }
 0x4de   : > { %2238 = vsyncadd (%p2533_p11), [#allocation7], 4294966272 }
 0x4df PF: > { %s22_s26 = sadd.s32 1, %s2257_s26   ;;  %s2581_s23 = smov %s2245_s24 }
 0x4e0   : > { %p19_p10 = scmp.ge.s32.totalorder %s22_s26, 4   ;;  %s2582_s24 = smov %s2333_s6 }
 0x4e1   : > { %s2583_s25 = smov %s2253_s0  ;;  %s2584_s0 = smov %s2586_s28 }
 0x4e2   :  { %21 = sbr.rel (!%p19_p10) target bundleno = 18 (0x12), region = 140 }
 0x4e9   :  { %1645 = vsyncpa [#allocation7], 1 }
 0x4ea   :  { %1647 = vsyncpa [#allocation7 + $0x1], 1 }

</bundles_post_ra>
